<compile_context>
chip_gen: v7x
topology: tpu7x:2x2x1
jax: 0.10.0
libtpu: 0.0.40
codegen_flags: <defaults>
</compile_context>

<pallas_src>
import functools

import numpy as np
import jax
import jax.numpy as jnp
from jax.experimental import pallas as pl
from jax.experimental.pallas import tpu as pltpu


# ---------------------------------------------------------------------------
# Window-folded, column-packed real-DFT basis (cached across calls).
# Column layout (Fh = n_fft // 2):
#   col f           (0 <= f < Fh): window * cos(2*pi*k*f/n_fft)    (Re, bin f)
#   col Fh + 0                   : window * cos(pi*k)              (Re, Nyquist)
#   col Fh + f      (1 <= f < Fh): -window * sin(2*pi*k*f/n_fft)   (Im, bin f)
# ---------------------------------------------------------------------------
def _build_packed_basis(n_fft, window_np):
    if n_fft % 2:
        raise NotImplementedError("n_fft must be even")
    Fh = n_fft // 2
    k = np.arange(n_fft, dtype=np.int64)[:, None]
    f = np.arange(Fh, dtype=np.int64)[None, :]
    # exact integer reduction of k*f mod n_fft before forming the float angle
    ang = 2.0 * np.pi * ((k * f) % n_fft).astype(np.float64) / n_fft
    w = window_np.astype(np.float64).reshape(n_fft, 1)
    re = w * np.cos(ang)                                   # (n_fft, Fh)
    im = -w * np.sin(ang)                                  # (n_fft, Fh); col0 == 0
    im[:, 0] = w[:, 0] * np.cos(np.pi * np.arange(n_fft))  # pack Nyquist real part
    return jnp.asarray(np.concatenate([re, im], axis=1), dtype=jnp.bfloat16)


@functools.lru_cache(maxsize=8)
def _default_packed_basis(n_fft):
    n = np.arange(n_fft, dtype=np.float64)
    hann = 0.5 - 0.5 * np.cos(2.0 * np.pi * n / n_fft)     # torch.hann_window
    return _build_packed_basis(n_fft, hann)


# ---------------------------------------------------------------------------
# Kernel: one (bc, frame-tile) grid step.
#   ycur_ref : (TM, hop)     f32  -- Y[s, r] = padded_signal[s*hop + r]
#   ynxt_ref : (NB, hop)     f32  -- first NB rows of the next tile (overlap)
#   dft_ref  : (n_fft,n_fft) bf16 -- window-folded packed real-DFT basis
#   out_ref  : (n_freq, TM)  f32  -- freq-major magnitude / power spectrogram
# ---------------------------------------------------------------------------
def _spectrogram_kernel(ycur_ref, ynxt_ref, dft_ref, out_ref, *, hop, n_fft, power):
    TM = ycur_ref.shape[0]
    Fh = n_fft // 2
    R = n_fft // hop

    ycur = ycur_ref[...].astype(jnp.bfloat16)              # bf16 cast in-kernel
    acc = jnp.dot(ycur, dft_ref[pl.ds(0, hop), :],
                  preferred_element_type=jnp.float32)
    if R > 1:
        ynxt = ynxt_ref[...].astype(jnp.bfloat16)
        for q in range(1, R):                              # hop-phase accumulation
            yq = jnp.concatenate([ycur[q:, :], ynxt[:q, :]], axis=0)
            acc = acc + jnp.dot(yq, dft_ref[pl.ds(q * hop, hop), :],
                                preferred_element_type=jnp.float32)

    # acc[t, c]: c < Fh -> Re[bin c]; c == Fh -> Re[Nyquist]; c > Fh -> Im[bin c-Fh]
    acc_t = jnp.transpose(acc)                             # (n_fft, TM), XLU
    re_t = acc_t[:Fh, :]
    sec_t = acc_t[Fh:, :]                                  # row0 = Re[Nyq], rows1.. = Im
    row = jax.lax.broadcasted_iota(jnp.int32, (Fh, TM), 0)
    im_t = jnp.where(row == 0, 0.0, sec_t)                 # drop Nyquist from main half
    main = re_t * re_t + im_t * im_t                       # bins 0 .. Fh-1
    nyq = sec_t[0:1, :] * sec_t[0:1, :]                    # bin Fh (Nyquist)
    if power == 1:
        main = jnp.sqrt(main)
        nyq = jnp.sqrt(nyq)
    out_ref[pl.ds(0, Fh), :] = main
    out_ref[pl.ds(Fh, 1), :] = nyq


# ---------------------------------------------------------------------------
# Wrapper
# ---------------------------------------------------------------------------
def spectrogram_pallas(x, *, n_fft=2048, hop=None, pad=0, window=None, power=1):
    """x: (batch, channel, signal) float32 -> (batch, channel, freq, time)."""
    if power not in (1, 2):
        # TODO(synk): power=None (complex stft output) variant.
        raise NotImplementedError("power must be 1 or 2")
    if hop is None:
        hop = n_fft // 4

    if window is None:
        dft = _default_packed_basis(n_fft)                 # cached across calls
    else:
        dft = _build_packed_basis(n_fft, np.asarray(window, dtype=np.float64))

    x = jnp.asarray(x, jnp.float32)
    B, C, _ = x.shape
    if pad > 0:
        x = jnp.pad(x, ((0, 0), (0, 0), (pad, pad)))       # module's constant pre-pad
    L = x.shape[-1]

    half = n_fft // 2
    xp = jnp.pad(x, ((0, 0), (0, 0), (half, half)), mode="reflect")   # center=True
    n_frames = L // hop + 1
    n_freq = n_fft // 2 + 1
    BC = B * C
    xp = xp.reshape(BC, -1)

    if n_fft % hop == 0 and n_fft // hop <= 64:
        hop_eff, R = hop, n_fft // hop
    else:
        # TODO(synk): in-kernel framing for hop values that do not divide n_fft;
        # this fallback materializes the frames with an XLA gather (slow path).
        hop_eff, R = n_fft, 1
        idx = jnp.arange(n_frames)[:, None] * hop + jnp.arange(n_fft)[None, :]
        xp = xp[:, idx].reshape(BC, n_frames * n_fft)

    # Frame-tile: multiple of 128 (lane-dense output stores, bf16 sublane packing).
    if n_frames >= 128:
        TM = min(512, (n_frames // 128) * 128)
        T_out = n_frames                # exact time axis; last block partially masked
    else:
        TM = 128
        T_out = TM                      # tiny case: pad + slice afterwards
    num_tiles = (n_frames + TM - 1) // TM
    NB = 8                              # overlap rows for the "next" block (>= R-1)
    while NB < R - 1:
        NB *= 2
    nxt_stride = TM // NB

    # Y[s, r] = padded_signal[s*hop + r]; rows past the signal are zero and only
    # feed frames >= n_frames (masked / sliced away).
    S_pad = num_tiles * TM + NB
    need = S_pad * hop_eff
    xp = jnp.pad(xp, ((0, 0), (0, max(0, need - xp.shape[-1]))))[:, :need]
    Y = xp.reshape(BC, S_pad, hop_eff)

    kernel = functools.partial(_spectrogram_kernel, hop=hop_eff, n_fft=n_fft,
                               power=power)

    # Resident weight (constant index map).  Single-buffer it once it is big
    # enough to matter for the VMEM budget (v7x: 64 MiB physical; an
    # n_fft=2048 basis is ~8 MiB in bf16, double-buffering it is pure waste).
    if n_fft * n_fft * 2 >= 2 * 1024 * 1024:
        dft_spec = pl.BlockSpec((n_fft, n_fft), lambda bc, i: (0, 0),
                                pipeline_mode=pl.Buffered(1))
    else:
        dft_spec = pl.BlockSpec((n_fft, n_fft), lambda bc, i: (0, 0))

    out = pl.pallas_call(
        kernel,
        out_shape=jax.ShapeDtypeStruct((BC, n_freq, T_out), jnp.float32),
        grid=(BC, num_tiles),
        in_specs=[
            pl.BlockSpec((None, TM, hop_eff), lambda bc, i: (bc, i, 0)),
            pl.BlockSpec((None, NB, hop_eff),
                         lambda bc, i: (bc, (i + 1) * nxt_stride, 0)),
            dft_spec,
        ],
        out_specs=pl.BlockSpec((None, n_freq, TM), lambda bc, i: (bc, 0, i)),
        compiler_params=pltpu.CompilerParams(
            dimension_semantics=("parallel", "parallel"),
            vmem_limit_bytes=48 * 1024 * 1024,
        ),
    )(Y, Y, dft)

    if T_out != n_frames:
        out = out[:, :, :n_frames]
    return out.reshape(B, C, n_freq, n_frames)   # (batch, channel, freq, time)


# ---------------------------------------------------------------------------
# Pure-JAX f32 reference (rfft) for the sanity check.
# ---------------------------------------------------------------------------
def _reference_spectrogram(x, *, n_fft, hop, pad=0, power=1):
    n = jnp.arange(n_fft, dtype=jnp.float32)
    window = 0.5 - 0.5 * jnp.cos(2.0 * jnp.pi * n / n_fft)
    x = jnp.asarray(x, jnp.float32)
    if pad > 0:
        x = jnp.pad(x, ((0, 0), (0, 0), (pad, pad)))
    L = x.shape[-1]
    half = n_fft // 2
    xp = jnp.pad(x, ((0, 0), (0, 0), (half, half)), mode="reflect")
    n_frames = L // hop + 1
    idx = jnp.arange(n_frames)[:, None] * hop + jnp.arange(n_fft)[None, :]
    frames = xp[:, :, idx] * window
    mag = jnp.abs(jnp.fft.rfft(frames, axis=-1))
    if power == 2:
        mag = mag * mag
    return jnp.transpose(mag, (0, 1, 3, 2))


if __name__ == "__main__":
    key = jax.random.PRNGKey(0)
    k1, k2 = jax.random.split(key)

    # Config 1: single frame-tile, padded time axis (n_frames < 128), power=1.
    n_fft1, hop1 = 128, 32
    x1 = jax.random.normal(k1, (2, 2, 2048), dtype=jnp.float32)
    out1 = jax.block_until_ready(
        spectrogram_pallas(x1, n_fft=n_fft1, hop=hop1, power=1))
    ref1 = _reference_spectrogram(x1, n_fft=n_fft1, hop=hop1, power=1)
    assert out1.shape == (2, 2, n_fft1 // 2 + 1, 2048 // hop1 + 1), out1.shape
    err1 = float(jnp.max(jnp.abs(out1 - ref1)) / jnp.max(jnp.abs(ref1)))
    assert err1 < 3e-2, err1

    # Config 2: multi-tile, exact (unpadded) time axis with a partial last
    # output block, cross-tile frame overlap, power=2.
    n_fft2, hop2 = 256, 64
    x2 = jax.random.normal(k2, (1, 2, 8192), dtype=jnp.float32)
    out2 = jax.block_until_ready(
        spectrogram_pallas(x2, n_fft=n_fft2, hop=hop2, power=2))
    ref2 = _reference_spectrogram(x2, n_fft=n_fft2, hop=hop2, power=2)
    assert out2.shape == (1, 2, n_fft2 // 2 + 1, 8192 // hop2 + 1), out2.shape
    err2 = float(jnp.max(jnp.abs(out2 - ref2)) / jnp.max(jnp.abs(ref2)))
    assert err2 < 5e-2, err2

    print("KERNEL_OK")
</pallas_src>

<mosaic_0001>
module attributes {stable_mosaic.version = 11 : i64} {
  func.func @_spectrogram_kernel(%arg0: i32, %arg1: i32, %arg2: memref<1x128x32xf32, #tpu.memory_space<vmem>>, %arg3: memref<1x8x32xf32, #tpu.memory_space<vmem>>, %arg4: memref<128x128xbf16, #tpu.memory_space<vmem>>, %arg5: memref<1x65x128xf32, #tpu.memory_space<vmem>>) attributes {dimension_semantics = [#tpu.dimension_semantics<parallel>, #tpu.dimension_semantics<parallel>], iteration_bounds = array<i64: 4, 1>, scalar_prefetch = 0 : i64, scratch_operands = 0 : i64, tpu.core_type = #tpu.core_type<tc>, window_params = [{transform_indices = @transform_0, window_bounds = array<i64: 1, 128, 32>}, {transform_indices = @transform_1, window_bounds = array<i64: 1, 8, 32>}, {pipeline_mode = #tpu.pipeline_mode<synchronous>, transform_indices = @transform_2, window_bounds = array<i64: 128, 128>}, {transform_indices = @transform_3, window_bounds = array<i64: 1, 65, 128>}]} {
    %c0 = arith.constant 0 : index
    %c0_0 = arith.constant 0 : index
    %c0_1 = arith.constant 0 : index
    %0 = vector.load %arg2[%c0, %c0_0, %c0_1] : memref<1x128x32xf32, #tpu.memory_space<vmem>>, vector<1x128x32xf32>
    %1 = vector.shape_cast %0 : vector<1x128x32xf32> to vector<128x32xf32>
    %2 = arith.truncf %1 : vector<128x32xf32> to vector<128x32xbf16>
    %c0_2 = arith.constant 0 : index
    %c0_3 = arith.constant 0 : index
    %3 = vector.load %arg4[%c0_2, %c0_3] : memref<128x128xbf16, #tpu.memory_space<vmem>>, vector<32x128xbf16>
    %cst = arith.constant dense<0.000000e+00> : vector<128x128xf32>
    %4 = tpu.matmul %2, %3, %cst {dimension_numbers = #tpu.dot_dimension_numbers<[1], [0], [0], [1], [0, 0, 1, 1], [], []>} : vector<128x32xbf16>, vector<32x128xbf16>, vector<128x128xf32> -> vector<128x128xf32>
    %c0_4 = arith.constant 0 : index
    %c0_5 = arith.constant 0 : index
    %c0_6 = arith.constant 0 : index
    %5 = vector.load %arg3[%c0_4, %c0_5, %c0_6] : memref<1x8x32xf32, #tpu.memory_space<vmem>>, vector<1x8x32xf32>
    %6 = vector.shape_cast %5 : vector<1x8x32xf32> to vector<8x32xf32>
    %7 = arith.truncf %6 : vector<8x32xf32> to vector<8x32xbf16>
    %8 = vector.extract_strided_slice %2 {offsets = [1, 0], sizes = [127, 32], strides = [1, 1]} : vector<128x32xbf16> to vector<127x32xbf16>
    %9 = vector.extract_strided_slice %7 {offsets = [0, 0], sizes = [1, 32], strides = [1, 1]} : vector<8x32xbf16> to vector<1x32xbf16>
    %10 = tpu.concatenate %8, %9 in 0 : vector<127x32xbf16>, vector<1x32xbf16> -> vector<128x32xbf16>
    %c32 = arith.constant 32 : index
    %c0_7 = arith.constant 0 : index
    %11 = vector.load %arg4[%c32, %c0_7] : memref<128x128xbf16, #tpu.memory_space<vmem>>, vector<32x128xbf16>
    %cst_8 = arith.constant dense<0.000000e+00> : vector<128x128xf32>
    %12 = tpu.matmul %10, %11, %cst_8 {dimension_numbers = #tpu.dot_dimension_numbers<[1], [0], [0], [1], [0, 0, 1, 1], [], []>} : vector<128x32xbf16>, vector<32x128xbf16>, vector<128x128xf32> -> vector<128x128xf32>
    %13 = arith.addf %4, %12 : vector<128x128xf32>
    %14 = vector.extract_strided_slice %2 {offsets = [2, 0], sizes = [126, 32], strides = [1, 1]} : vector<128x32xbf16> to vector<126x32xbf16>
    %15 = vector.extract_strided_slice %7 {offsets = [0, 0], sizes = [2, 32], strides = [1, 1]} : vector<8x32xbf16> to vector<2x32xbf16>
    %16 = tpu.concatenate %14, %15 in 0 : vector<126x32xbf16>, vector<2x32xbf16> -> vector<128x32xbf16>
    %c64 = arith.constant 64 : index
    %c0_9 = arith.constant 0 : index
    %17 = vector.load %arg4[%c64, %c0_9] : memref<128x128xbf16, #tpu.memory_space<vmem>>, vector<32x128xbf16>
    %cst_10 = arith.constant dense<0.000000e+00> : vector<128x128xf32>
    %18 = tpu.matmul %16, %17, %cst_10 {dimension_numbers = #tpu.dot_dimension_numbers<[1], [0], [0], [1], [0, 0, 1, 1], [], []>} : vector<128x32xbf16>, vector<32x128xbf16>, vector<128x128xf32> -> vector<128x128xf32>
    %19 = arith.addf %13, %18 : vector<128x128xf32>
    %20 = vector.extract_strided_slice %2 {offsets = [3, 0], sizes = [125, 32], strides = [1, 1]} : vector<128x32xbf16> to vector<125x32xbf16>
    %21 = vector.extract_strided_slice %7 {offsets = [0, 0], sizes = [3, 32], strides = [1, 1]} : vector<8x32xbf16> to vector<3x32xbf16>
    %22 = tpu.concatenate %20, %21 in 0 : vector<125x32xbf16>, vector<3x32xbf16> -> vector<128x32xbf16>
    %c96 = arith.constant 96 : index
    %c0_11 = arith.constant 0 : index
    %23 = vector.load %arg4[%c96, %c0_11] : memref<128x128xbf16, #tpu.memory_space<vmem>>, vector<32x128xbf16>
    %cst_12 = arith.constant dense<0.000000e+00> : vector<128x128xf32>
    %24 = tpu.matmul %22, %23, %cst_12 {dimension_numbers = #tpu.dot_dimension_numbers<[1], [0], [0], [1], [0, 0, 1, 1], [], []>} : vector<128x32xbf16>, vector<32x128xbf16>, vector<128x128xf32> -> vector<128x128xf32>
    %25 = arith.addf %19, %24 : vector<128x128xf32>
    %26 = tpu.transpose %25, [1, 0] : vector<128x128xf32> -> vector<128x128xf32>
    %27 = vector.extract_strided_slice %26 {offsets = [0, 0], sizes = [64, 128], strides = [1, 1]} : vector<128x128xf32> to vector<64x128xf32>
    %28 = vector.extract_strided_slice %26 {offsets = [64, 0], sizes = [64, 128], strides = [1, 1]} : vector<128x128xf32> to vector<64x128xf32>
    %29 = tpu.iota {dimensions = array<i32: 0>} : vector<64x128xi32>
    %c0_i32 = arith.constant 0 : i32
    %30 = vector.broadcast %c0_i32 : i32 to vector<64x128xi32>
    %31 = arith.cmpi eq, %29, %30 : vector<64x128xi32>
    %cst_13 = arith.constant 0.000000e+00 : f32
    %32 = vector.broadcast %cst_13 : f32 to vector<64x128xf32>
    %33 = arith.select %31, %32, %28 : vector<64x128xi1>, vector<64x128xf32>
    %34 = arith.mulf %27, %27 : vector<64x128xf32>
    %35 = arith.mulf %33, %33 : vector<64x128xf32>
    %36 = arith.addf %34, %35 : vector<64x128xf32>
    %37 = vector.extract_strided_slice %28 {offsets = [0, 0], sizes = [1, 128], strides = [1, 1]} : vector<64x128xf32> to vector<1x128xf32>
    %38 = vector.extract_strided_slice %28 {offsets = [0, 0], sizes = [1, 128], strides = [1, 1]} : vector<64x128xf32> to vector<1x128xf32>
    %39 = arith.mulf %37, %38 : vector<1x128xf32>
    %40 = math.sqrt %36 : vector<64x128xf32>
    %41 = math.sqrt %39 : vector<1x128xf32>
    %c0_14 = arith.constant 0 : index
    %c0_15 = arith.constant 0 : index
    %c0_16 = arith.constant 0 : index
    %42 = vector.load %arg5[%c0_14, %c0_15, %c0_16] : memref<1x65x128xf32, #tpu.memory_space<vmem>>, vector<1x64x128xf32>
    %43 = vector.shape_cast %42 : vector<1x64x128xf32> to vector<64x128xf32>
    %44 = vector.shape_cast %40 : vector<64x128xf32> to vector<1x64x128xf32>
    tpu.vector_store %arg5[%c0_14, %c0_15, %c0_16], %44 {strides = array<i32>} : memref<1x65x128xf32, #tpu.memory_space<vmem>>, vector<1x64x128xf32>,
    %c0_17 = arith.constant 0 : index
    %c64_18 = arith.constant 64 : index
    %c0_19 = arith.constant 0 : index
    %45 = vector.load %arg5[%c0_17, %c64_18, %c0_19] : memref<1x65x128xf32, #tpu.memory_space<vmem>>, vector<1x1x128xf32>
    %46 = vector.shape_cast %45 : vector<1x1x128xf32> to vector<1x128xf32>
    %47 = vector.shape_cast %41 : vector<1x128xf32> to vector<1x1x128xf32>
    tpu.vector_store %arg5[%c0_17, %c64_18, %c0_19], %47 {strides = array<i32>} : memref<1x65x128xf32, #tpu.memory_space<vmem>>, vector<1x1x128xf32>,
    return
  }
  func.func @transform_0(%arg0: i32, %arg1: i32) -> (i32, i32, i32) {
    %c0_i32 = arith.constant 0 : i32
    %c0_i32_0 = arith.constant 0 : i32
    return %arg0, %arg1, %c0_i32 : i32, i32, i32
  }
  func.func @transform_1(%arg0: i32, %arg1: i32) -> (i32, i32, i32) {
    %c1_i32 = arith.constant 1 : i32
    %0 = arith.addi %arg1, %c1_i32 : i32
    %c16_i32 = arith.constant 16 : i32
    %1 = arith.muli %0, %c16_i32 : i32
    %c0_i32 = arith.constant 0 : i32
    %c0_i32_0 = arith.constant 0 : i32
    return %arg0, %1, %c0_i32 : i32, i32, i32
  }
  func.func @transform_2(%arg0: i32, %arg1: i32) -> (i32, i32) {
    %c0_i32 = arith.constant 0 : i32
    %c0_i32_0 = arith.constant 0 : i32
    %c0_i32_1 = arith.constant 0 : i32
    return %c0_i32, %c0_i32_0 : i32, i32
  }
  func.func @transform_3(%arg0: i32, %arg1: i32) -> (i32, i32, i32) {
    %c0_i32 = arith.constant 0 : i32
    %c0_i32_0 = arith.constant 0 : i32
    return %arg0, %c0_i32, %arg1 : i32, i32, i32
  }
}

</mosaic_0001>

<bundles_post_ra>
// kernel: tpu_custom_call.1
= control target key start
LH: loop header
LB: loop body
LE: loop exit
PB: predicated region body
PF: predicated region fallthrough
CT: control target
= control target key end

     0   :  { %s1588_s12 = smov 0   ;;  %s1590_s13 = smov 0   ;;  %s1855_s0 = inlined_call_operand.vmem [shape: f32[4,136,32], index: 0, kind: input, shape index: {}]   ;;  %s1856_s1 = inlined_call_operand.vmem [shape: f32[4,136,32], index: 1, kind: input, shape index: {}]   ;;  %s1857_s2 = inlined_call_operand.vmem [shape: bf16[128,128], index: 2, kind: input, shape index: {}]   ;;  %s1858_s3 = inlined_call_operand.vmem [shape: f32[4,65,128], index: 3, kind: output, shape index: {}]  }
   0x1   :  { %s1592_s14 = smov 0  }
   0x2 LB: > { %s25_s15 = sadd.s32 1, %s1562_s13  ;;  %p1274_p0 = scmp.ge.s32.totalorder %s1566_s14, 1  ;;  %s1566_s14 = sphi %s1592_s14, %s13_s14   ;;  %s1562_s13 = sphi %s1590_s13, %s1860_s13   ;;  %s1558_s12 = sphi %s1588_s12, %s1859_s12  }
   0x3   : > { %p27_p1 = scmp.ge.s32.totalorder %s25_s15, 4  ;;  %p189_p2 = scmp.lt.s32.totalorder %s1566_s14, 5 }
   0x5   : > { %s1862_s15 = smov (%p27_p1, %s25_s15), 0  ;;  %p190_p3 = pnand %p1274_p0, %p189_p2 }
   0x6   : > { %v1518_v0 = vld [vmem:[%s1857_s2 + $0x20] sm:$0xff] (!%p190_p3)   ;;  %p239_p4 = scmp.lt.s32.totalorder (!%p190_p3), %s1558_s12, 3  ;;  %v1519_v1 = vld [vmem:[%s1857_s2 + $0x10] sm:$0xff] (!%p190_p3)   ;;  %v1520_v2 = vld [vmem:[%s1857_s2 + $0x28] sm:$0xff] (!%p190_p3)   ;;  %vm392_vm0 = vcmask (!%p190_p3), 261120   ;;  %vm647_vm1 = vcmask (!%p190_p3), 1046528  }
   0x7   : > { %193 = sbr.rel (%p190_p3) target bundleno = 485 (0x1e5), region = 32  ;;  %1402 = vmatprep.subr.bf16.mxu0 (!%p190_p3), %v1518_v0  ;;  %1362 = vmatprep.subr.bf16.mxu1 (!%p190_p3), %v1519_v1  ;;  %v1521_v3 = vld [vmem:[%s1857_s2 + $0x18] sm:$0xff] (!%p190_p3)   ;;  %v1624_v4 = vld [vmem:[%s1857_s2] sm:$0xff] (!%p190_p3)   ;;  %v1523_v5 = vld [vmem:[%s1857_s2 + $0x30] sm:$0xff] (!%p190_p3)   ;;  %vm303_vm2 = vsmask.f32 (!%p190_p3), 7424 }
   0x8   : > { %1403 = vmatpush3.bf16.msra.mxu0 (!%p190_p3), %v1518_v0  ;;  %1363 = vmatpush3.bf16.msra.mxu1 (!%p190_p3), %v1519_v1  ;;  %v1525_v35 = vld [vmem:[%s1857_s2 + $0x38] sm:$0xff] (!%p190_p3)   ;;  %v1524_v46 = vld [vmem:[%s1857_s2 + $0x8] sm:$0xff] (!%p190_p3)   ;;  %vm373_vm3 = vcmask (!%p190_p3), 1047552   ;;  %vm821_vm4 = vsmask.f32 (!%p190_p3), 6400 }
   0x9   : > { %1404 = vmatprep.subr.bf16.mxu0 (!%p190_p3), %v1520_v2  ;;  %1364 = vmatprep.subr.bf16.mxu1 (!%p190_p3), %v1521_v3  ;;  %vm374_vm5 = vmand (!%p190_p3), %vm373_vm3, %vm303_vm2 }
   0xa   : > { %vm860_vm6 = vmand (!%p190_p3), %vm647_vm1, %vm821_vm4 }
   0xc   : > { %1405 = vmatpush3.bf16.msra.mxu0 (!%p190_p3), %v1520_v2  ;;  %1365 = vmatpush3.bf16.msra.mxu1 (!%p190_p3), %v1521_v3 }
   0xd   : > { %1422 = vmatprep.subr.bf16.mxu0 (!%p190_p3), %v1523_v5  ;;  %1382 = vmatprep.subr.bf16.mxu1 (!%p190_p3), %v1624_v4 }
   0xe   : > { %s1864_s12 = smov (!%p239_p4, %s1558_s12), 3 }
   0xf   : > { %s1490_s24 = smul.u32 136, %s1864_s12 }
  0x10   : > { %s1492_s17 = smul.u32 72, %s1864_s12 }
  0x11   : > { %s1634_s4 = scalar_lea.vmem %s1855_s0, %s1490_s24  ;;  %s1321_s9 = sadd.s32 128, %s1490_s24 }
  0x12   : > { %v273_v6 = vld [vmem:[%s1634_s4] sm:$0xff]  ;;  %v274_v7 = vld [vmem:[%s1634_s4 + $0x8] sm:$0xff]  ;;  %v275_v8 = vld [vmem:[%s1634_s4 + $0x10] sm:$0xff]  ;;  %s261_s16 = scalar_lea.vmem %s1856_s1, %s1321_s9  ;;  %s1831_s20 = scalar_lea.vmem %s1858_s3, %s1492_s17 }
  0x13   : > { %v276_v9 = vld [vmem:[%s1634_s4 + $0x18] sm:$0xff]  ;;  %v1640_v10 = vpack.c.bf16 %v274_v7, %v273_v6  ;;  %v277_v11 = vld [vmem:[%s1634_s4 + $0x20] sm:$0xff]  ;;  %v278_v12 = vld [vmem:[%s1634_s4 + $0x28] sm:$0xff] }
  0x14   : > { %v1644_v13 = vpack.c.bf16 %v276_v9, %v275_v8  ;;  %v1646_v14 = vpack.c.bf16 %v278_v12, %v277_v11  ;;  %v279_v15 = vld [vmem:[%s1634_s4 + $0x30] sm:$0xff]  ;;  %v280_v16 = vld [vmem:[%s1634_s4 + $0x38] sm:$0xff]  ;;  %v281_v25 = vld [vmem:[%s1634_s4 + $0x40] sm:$0xff] }
  0x15   : > { %v648_v17 = vrot.slane %v1640_v10, 1  ;;  %v305_v18 = vshrl.u32 %v1640_v10, 16  ;;  %v307_v19 = vshll.u32 %v1640_v10, 16  ;;  %v1654_v20 = vpack.c.bf16 %v280_v16, %v279_v15  ;;  %v282_v29 = vld [vmem:[%s1634_s4 + $0x48] sm:$0xff]  ;;  %v283_v30 = vld [vmem:[%s1634_s4 + $0x50] sm:$0xff]  ;;  %v284_v31 = vld [vmem:[%s1634_s4 + $0x58] sm:$0xff] }
  0x16   : > { %v649_v21 = vrot.slane %v1644_v13, 1  ;;  %v651_v22 = vrot.slane %v1646_v14, 1  ;;  %v312_v23 = vshll.u32 %v1644_v13, 16  ;;  %v316_v24 = vshrl.u32 %v1644_v13, 16  ;;  %v285_v51 = vld [vmem:[%s1634_s4 + $0x60] sm:$0xff]  ;;  %v286_v52 = vld [vmem:[%s1634_s4 + $0x68] sm:$0xff] }
  0x17   : > { %v309_v26 = vrot.slane %v307_v19, 1  ;;  %v320_v27 = vshll.u32 %v1646_v14, 16  ;;  %v653_v28 = vrot.slane %v1654_v20, 1  ;;  %v1684_v40 = vpack.c.bf16 %v282_v29, %v281_v25  ;;  %v287_v55 = vld [vmem:[%s1634_s4 + $0x70] sm:$0xff]  ;;  %v288_v56 = vld [vmem:[%s1634_s4 + $0x78] sm:$0xff]  ;;  %v301_v15 = vld [vmem:[%s261_s16] sm:$0xff] }
  0x18   : > { %v650_v32 = vsel %vm647_vm1, %v648_v17, %v649_v21  ;;  %v652_v33 = vsel %vm647_vm1, %v649_v21, %v651_v22  ;;  %v314_v34 = vrot.slane %v312_v23, 1  ;;  %v324_v41 = vshrl.u32 %v1646_v14, 16 }
  0x19   : > { %1406 = vmatprep.mubr.msk.bf16.mxu0 %vm392_vm0, %v650_v32  ;;  %v310_v36 = vor.u32 %v309_v26, %v305_v18  ;;  %v322_v37 = vrot.slane %v320_v27, 1  ;;  %v654_v38 = vsel %vm647_vm1, %v651_v22, %v653_v28  ;;  %v328_v42 = vshll.u32 %v1654_v20, 16 }
  0x1a   : > { %1407 = vmatmul.mubr.msk.bf16.vlgmr.msra.gmra.mrb[0].mxu0 %vm392_vm0, %v652_v33  ;;  %v318_v39 = vor.u32 %v316_v24, %v314_v34  ;;  %v332_v44 = vshrl.u32 %v1654_v20, 16  ;;  %v1691_v45 = vpack.c.bf16 %v284_v31, %v283_v30  ;;  %v655_v48 = vrot.slane %v1684_v40, 1 }
  0x1b   : > { %v315_v43 = vsel %vm303_vm2, %v310_v36, %v314_v34  ;;  %1423 = vmatpush3.bf16.msra.mxu0 %v1523_v5  ;;  %1410 = vmatprep.mubr.msk.bf16.mxu0 %vm392_vm0, %v654_v38  ;;  %v326_v49 = vor.u32 %v324_v41, %v322_v37  ;;  %v330_v50 = vrot.slane %v328_v42, 1  ;;  %v336_v53 = vshll.u32 %v1684_v40, 16 }
  0x1c   : > { %1366 = vmatprep.mubr.msk.bf16.mxu1 %vm392_vm0, %v315_v43  ;;  %v323_v47 = vsel %vm303_vm2, %v318_v39, %v322_v37  ;;  %1424 = vmatprep.subr.bf16.mxu0 %v1525_v35  ;;  %v657_v54 = vrot.slane %v1691_v45, 1  ;;  %v340_v59 = vshrl.u32 %v1684_v40, 16  ;;  %v656_v60 = vsel %vm647_vm1, %v653_v28, %v655_v48 }
  0x1d   : > { %1367 = vmatmul.mubr.msk.bf16.vlgmr.msra.gmra.mrb[0].mxu1 %vm392_vm0, %v323_v47  ;;  %v331_v57 = vsel %vm303_vm2, %v326_v49, %v330_v50  ;;  %v334_v58 = vor.u32 %v332_v44, %v330_v50  ;;  %v338_v61 = vrot.slane %v336_v53, 1  ;;  %v1721_v62 = vpack.c.bf16 %v286_v52, %v285_v51 }
  0x1e   : > { %1383 = vmatpush3.bf16.msra.mxu1 %v1624_v4  ;;  %1370 = vmatprep.mubr.msk.bf16.mxu1 %vm392_vm0, %v331_v57  ;;  %v344_v63 = vshll.u32 %v1691_v45, 16  ;;  %v658_v0 = vsel %vm647_vm1, %v655_v48, %v657_v54  ;;  %v1725_v1 = vpack.c.bf16 %v288_v56, %v287_v55  ;;  %v348_v6 = vshrl.u32 %v1691_v45, 16 }
  0x1f   : > { %1384 = vmatprep.subr.bf16.mxu1 %v1524_v46  ;;  %1425 = vmatpush3.bf16.msra.mxu0 %v1525_v35  ;;  %v342_v2 = vor.u32 %v340_v59, %v338_v61  ;;  %v352_v4 = vshll.u32 %v1721_v62, 16  ;;  %v339_v5 = vsel %vm303_vm2, %v334_v58, %v338_v61  ;;  %v659_v7 = vrot.slane %v1721_v62, 1 }
  0x20   : > { %v346_v3 = vrot.slane %v344_v63, 1  ;;  %v356_v9 = vshrl.u32 %v1721_v62, 16  ;;  %v360_v11 = vshll.u32 %v1725_v1, 16  ;;  %v661_v12 = vrot.slane %v1725_v1, 1 }
  0x21   : > { %v354_v16 = vrot.slane %v352_v4, 1  ;;  %v822_v17 = vrot.slane %v305_v18, 1  ;;  %v660_v22 = vsel %vm647_vm1, %v657_v54, %v659_v7  ;;  %v1751_v25 = vpack.c.bf16 %v301_v15, %v301_v15 }
  0x22   : > { %1411 = vmatmul.mubr.msk.bf16.gmra.mrb[4].mxu0 %vm392_vm0, %v656_v60  ;;  %1385 = vmatpush3.bf16.msra.mxu1 %v1524_v46  ;;  %v347_v8 = vsel %vm303_vm2, %v342_v2, %v346_v3  ;;  %v350_v21 = vor.u32 %v348_v6, %v346_v3  ;;  %v362_v28 = vrot.slane %v360_v11, 1  ;;  %v826_v29 = vrot.slane %v312_v23, 2 }
  0x23   : > { %1414 = vmatprep.mubr.msk.bf16.mxu0 %vm392_vm0, %v658_v0  ;;  %v358_v26 = vor.u32 %v356_v9, %v354_v16  ;;  %v662_v30 = vsel %vm647_vm1, %v659_v7, %v661_v12  ;;  %v823_v31 = vrot.slane %v307_v19, 2  ;;  %v825_v18 = vrot.slane %v316_v24, 1 }
  0x24   : > { %v355_v32 = vsel %vm303_vm2, %v350_v21, %v354_v16  ;;  %v364_v33 = vshrl.u32 %v1725_v1, 16  ;;  %v369_v34 = vshll.u32 %v1751_v25, 16  ;;  %v664_v23 = vrot.slane %v1751_v25, 1 }
  0x25   : > { %1371 = vmatmul.mubr.msk.bf16.gmra.mrb[4].mxu1 %vm392_vm0, %v339_v5  ;;  %v363_v35 = vsel %vm303_vm2, %v358_v26, %v362_v28  ;;  %v824_v36 = vor.u32 %v823_v31, %v822_v17  ;;  %v827_v19 = vor.u32 %v826_v29, %v825_v18  ;;  %v830_v38 = vrot.slane %v320_v27, 2 }
  0x26   : > { %1374 = vmatprep.mubr.msk.bf16.mxu1 %vm392_vm0, %v347_v8  ;;  %v366_v24 = vor.u32 %v364_v33, %v362_v28  ;;  %v371_v37 = vrot.slane %v369_v34, 1  ;;  %v829_v39 = vrot.slane %v324_v41, 1  ;;  %v668_v43 = vsel %vm647_vm1, %v661_v12, %v664_v23 }
  0x27   : > { %v828_v46 = vsel %vm821_vm4, %v824_v36, %v827_v19  ;;  %v833_v47 = vrot.slane %v332_v44, 1  ;;  %v834_v48 = vrot.slane %v328_v42, 2  ;;  %v837_v44 = vrot.slane %v340_v59, 1 }
  0x28   : > { %v375_v49 = vsel %vm374_vm5, %v366_v24, %v371_v37  ;;  %v831_v27 = vor.u32 %v830_v38, %v829_v39  ;;  %v838_v42 = vrot.slane %v336_v53, 2  ;;  %v841_v52 = vrot.slane %v348_v6, 1 }
  0x29   : > { %v835_v50 = vor.u32 %v834_v48, %v833_v47  ;;  %v842_v54 = vrot.slane %v344_v63, 2  ;;  %v845_v56 = vrot.slane %v356_v9, 1  ;;  %v846_v57 = vrot.slane %v352_v4, 2 }
  0x2a   : > { %1415 = vmatmul.mubr.msk.bf16.gmra.mrb[8].mxu0 %vm392_vm0, %v660_v22  ;;  %v832_v41 = vsel %vm821_vm4, %v827_v19, %v831_v27  ;;  %v839_v55 = vor.u32 %v838_v42, %v837_v44  ;;  %v849_v59 = vrot.slane %v364_v33, 1  ;;  %v850_v60 = vrot.slane %v360_v11, 2 }
  0x2b   : > { %1418 = vmatprep.mubr.msk.bf16.mxu0 %vm392_vm0, %v662_v30  ;;  %v836_v51 = vsel %vm821_vm4, %v831_v27, %v835_v50  ;;  %v847_v61 = vor.u32 %v846_v57, %v845_v56  ;;  %v857_v2 = vrot.slane %v369_v34, 2 }
  0x2c   : > { %v840_v53 = vsel %vm821_vm4, %v835_v50, %v839_v55  ;;  %v851_v63 = vor.u32 %v850_v60, %v849_v59  ;;  %v1047_v60 = vlaneseq }
  0x2d   : > { %1375 = vmatmul.mubr.msk.bf16.gmra.mrb[8].mxu1 %vm392_vm0, %v355_v32 }
  0x2e   : > { %1378 = vmatprep.mubr.msk.bf16.mxu1 %vm392_vm0, %v363_v35  ;;  %v852_v3 = vsel %vm821_vm4, %v847_v61, %v851_v63 }
  0x32   : > { %1419 = vmatmul.mubr.msk.bf16.gmra.mrb[12].mxu0 %vm392_vm0, %v668_v43 }
  0x33   : > { %1426 = vmatprep.mubr.msk.bf16.mxu0 %vm392_vm0, %v828_v46 }
  0x35   : > { %1379 = vmatmul.mubr.msk.bf16.gmra.mrb[12].mxu1 %vm392_vm0, %v375_v49 }
  0x36   : > { %1386 = vmatprep.mubr.msk.bf16.mxu1 %vm392_vm0, %v1640_v10  ;;  %v843_v10 = vor.u32 %v842_v54, %v841_v52 }
  0x38   : > { %v844_v58 = vsel %vm821_vm4, %v839_v55, %v843_v10 }
  0x3a   : > { %1427 = vmatmul.mubr.msk.bf16.vlgmr.msra.gmra.mrb[0].mxu0 %vm392_vm0, %v832_v41 }
  0x3b   : > { %1430 = vmatprep.mubr.msk.bf16.mxu0 %vm392_vm0, %v836_v51 }
  0x3d   : > { %1387 = vmatmul.mubr.msk.bf16.vlgmr.msra.gmra.mrb[0].mxu1 %vm392_vm0, %v1644_v13  ;;  %v854_v13 = vshrl.u32 %v1751_v25, 16 }
  0x3e   : > { %1390 = vmatprep.mubr.msk.bf16.mxu1 %vm392_vm0, %v1646_v14  ;;  %v848_v14 = vsel %vm821_vm4, %v843_v10, %v847_v61 }
  0x3f   : > { %v856_v0 = vrot.slane %v854_v13, 1  ;;  %v1048_v13 = vshrl.u32 %v1047_v60, 7 }
  0x41   : > { %v858_v4 = vor.u32 %v857_v2, %v856_v0  ;;  %vm1056_vm7 = vcmp.eq.s32.totalorder %v1048_v13, 0 }
  0x42   : > { %1431 = vmatmul.mubr.msk.bf16.gmra.mrb[4].mxu0 %vm392_vm0, %v840_v53 }
  0x43   : > { %1434 = vmatprep.mubr.msk.bf16.mxu0 %vm392_vm0, %v844_v58 }
  0x45   : > { %1391 = vmatmul.mubr.msk.bf16.gmra.mrb[4].mxu1 %vm392_vm0, %v1654_v20  ;;  %v861_v20 = vsel %vm860_vm6, %v851_v63, %v858_v4 }
  0x46   : > { %1394 = vmatprep.mubr.msk.bf16.mxu1 %vm392_vm0, %v1684_v40 }
  0x4a   : > { %1435 = vmatmul.mubr.msk.bf16.gmra.mrb[8].mxu0 %vm392_vm0, %v848_v14 }
  0x4b   : > { %1438 = vmatprep.mubr.msk.bf16.mxu0 %vm392_vm0, %v852_v3 }
  0x4d   : > { %1395 = vmatmul.mubr.msk.bf16.gmra.mrb[8].mxu1 %vm392_vm0, %v1691_v45 }
  0x4e   : > { %1398 = vmatprep.mubr.msk.bf16.mxu1 %vm392_vm0, %v1721_v62 }
  0x52   : > { %1439 = vmatmul.mubr.msk.bf16.gmra.mrb[12].mxu0 %vm392_vm0, %v861_v20 }
  0x55   : > { %1399 = vmatmul.mubr.msk.bf16.gmra.mrb[12].mxu1 %vm392_vm0, %v1725_v1 }
 0x10d   : > { %v1428_v40 = vpop.f32.mrb[0].mxu0 }
 0x10e   : > { %v936_v5 = vpop.f32.mrb[1].mxu0 }
 0x10f   : > { %v1429_v6 = vpop.f32.mrb[2].mxu0 }
 0x110   : > { %v939_v7 = vpop.f32.mrb[3].mxu0  ;;  %v1388_v8 = vpop.f32.mrb[0].mxu1 }
 0x111   : > { %v1442_v9 = vadd.f32 %v1428_v40, %v1388_v8  ;;  %v576_v11 = vpop.f32.mrb[1].mxu1 }
 0x112   : > { %v1389_v12 = vpop.f32.mrb[2].mxu1  ;;  %v1443_v15 = vadd.f32 %v936_v5, %v576_v11 }
 0x113   : > { %v1444_v16 = vadd.f32 %v1429_v6, %v1389_v12  ;;  %v579_v45 = vpop.f32.mrb[3].mxu1 }
 0x114   : > { %v1445_v17 = vadd.f32 %v939_v7, %v579_v45  ;;  %1015 = vxpose.xlu0.b32.start [1/16] %v1443_v15, 128 }
 0x115   : > { %v1432_v62 = vpop.f32.mrb[4].mxu0 }
 0x116   : > { %v952_v21 = vpop.f32.mrb[5].mxu0 }
 0x117   : > { %v1433_v22 = vpop.f32.mrb[6].mxu0 }
 0x118   : > { %v955_v25 = vpop.f32.mrb[7].mxu0  ;;  %v1392_v26 = vpop.f32.mrb[4].mxu1  ;;  %1016 = vxpose.xlu0.b32.cont [2/16] %v1445_v17, 128 }
 0x119   : > { %v1446_v1 = vadd.f32 %v1432_v62, %v1392_v26  ;;  %v592_v28 = vpop.f32.mrb[5].mxu1 }
 0x11a   : > { %v1447_v29 = vadd.f32 %v952_v21, %v592_v28  ;;  %v1393_v30 = vpop.f32.mrb[6].mxu1 }
 0x11b   : > { %v1448_v31 = vadd.f32 %v1433_v22, %v1393_v30  ;;  %v595_v18 = vpop.f32.mrb[7].mxu1 }
 0x11c   : > { %v1449_v32 = vadd.f32 %v955_v25, %v595_v18  ;;  %1017 = vxpose.xlu0.b32.cont [3/16] %v1442_v9, 128 }
 0x11d   : > { %v1436_v33 = vpop.f32.mrb[8].mxu0 }
 0x11e   : > { %v968_v34 = vpop.f32.mrb[9].mxu0 }
 0x11f   : > { %v1437_v23 = vpop.f32.mrb[10].mxu0 }
 0x120   : > { %v971_v35 = vpop.f32.mrb[11].mxu0  ;;  %v1396_v36 = vpop.f32.mrb[8].mxu1  ;;  %1018 = vxpose.xlu0.b32.cont [4/16] %v1444_v16, 128 }
 0x121   : > { %v1450_v19 = vadd.f32 %v1436_v33, %v1396_v36  ;;  %v608_v24 = vpop.f32.mrb[9].mxu1 }
 0x122   : > { %v1451_v37 = vadd.f32 %v968_v34, %v608_v24  ;;  %v1397_v38 = vpop.f32.mrb[10].mxu1 }
 0x123   : > { %v1452_v39 = vadd.f32 %v1437_v23, %v1397_v38  ;;  %v611_v43 = vpop.f32.mrb[11].mxu1 }
 0x124   : > { %v1453_v46 = vadd.f32 %v971_v35, %v611_v43  ;;  %1019 = vxpose.xlu0.b32.cont [5/16] %v1447_v29, 128 }
 0x125   : > { %v1440_v47 = vpop.f32.mrb[12].mxu0 }
 0x126   : > { %v984_v48 = vpop.f32.mrb[13].mxu0 }
 0x127   : > { %v1441_v49 = vpop.f32.mrb[14].mxu0 }
 0x128   : > { %v987_v27 = vpop.f32.mrb[15].mxu0  ;;  %v1400_v50 = vpop.f32.mrb[12].mxu1  ;;  %1020 = vxpose.xlu0.b32.cont [6/16] %v1449_v32, 128 }
 0x129   : > { %v1454_v41 = vadd.f32 %v1440_v47, %v1400_v50  ;;  %v624_v44 = vpop.f32.mrb[13].mxu1 }
 0x12a   : > { %v1455_v42 = vadd.f32 %v984_v48, %v624_v44  ;;  %v1401_v51 = vpop.f32.mrb[14].mxu1 }
 0x12b   : > { %v1456_v52 = vadd.f32 %v1441_v49, %v1401_v51  ;;  %v627_v54 = vpop.f32.mrb[15].mxu1 }
 0x12c   : > { %v1457_v55 = vadd.f32 %v987_v27, %v627_v54  ;;  %1021 = vxpose.xlu0.b32.cont [7/16] %v1446_v1, 128 }
 0x130   : > { %1022 = vxpose.xlu0.b32.cont [8/16] %v1448_v31, 128 }
 0x134   : > { %1023 = vxpose.xlu0.b32.cont [9/16] %v1451_v37, 128 }
 0x138   : > { %1024 = vxpose.xlu0.b32.cont [10/16] %v1453_v46, 128 }
 0x13c   : > { %1025 = vxpose.xlu0.b32.cont [11/16] %v1450_v19, 128 }
 0x140   : > { %1026 = vxpose.xlu0.b32.cont [12/16] %v1452_v39, 128 }
 0x144   : > { %1027 = vxpose.xlu0.b32.cont [13/16] %v1455_v42, 128 }
 0x148   : > { %1028 = vxpose.xlu0.b32.cont [14/16] %v1457_v55, 128 }
 0x14c   : > { %1029 = vxpose.xlu0.b32.cont [15/16] %v1454_v41, 128 }
 0x150   : > { %1030 = vxpose.xlu0.b32.end [16/16] %v1456_v52, 128 }
 0x194   : > { %v1031_v10 = vpop.trf.xlu0 }
 0x195   : > { %v1072_v3 = vmul.f32 %v1031_v10, %v1031_v10 }
 0x198   : > { %v1032_v53 = vpop.trf.xlu0 }
 0x199   : > { %v1073_v5 = vmul.f32 %v1032_v53, %v1032_v53 }
 0x19c   : > { %v1033_v56 = vpop.trf.xlu0 }
 0x19d   : > { %v1074_v9 = vmul.f32 %v1033_v56, %v1033_v56 }
 0x1a0   : > { %v1034_v57 = vpop.trf.xlu0 }
 0x1a1   : > { %v1075_v45 = vmul.f32 %v1034_v57, %v1034_v57 }
 0x1a4   : > { %v1035_v58 = vpop.trf.xlu0 }
 0x1a5   : > { %v1076_v30 = vmul.f32 %v1035_v58, %v1035_v58 }
 0x1a8   : > { %v1036_v59 = vpop.trf.xlu0 }
 0x1a9   : > { %v1077_v19 = vmul.f32 %v1036_v59, %v1036_v59 }
 0x1ac   : > { %v1823_v61 = vpop.trf.xlu0 }
 0x1ad   : > { %v1078_v49 = vmul.f32 %v1823_v61, %v1823_v61 }
 0x1b0   : > { %v1825_v63 = vpop.trf.xlu0 }
 0x1b1   : > { %v1079_v55 = vmul.f32 %v1825_v63, %v1825_v63 }
 0x1b4   : > { %v1039_v14 = vpop.trf.xlu0 }
 0x1b5   : > { %v1064_v0 = vsel %vm1056_vm7, 0.0, %v1039_v14  ;;  %v1096_v2 = vmul.f32 %v1039_v14, %v1039_v14 }
 0x1b6   : > { %v1080_v4 = vmul.f32 %v1064_v0, %v1064_v0 }
 0x1b7   : > { %1526 = vrsqrt.f32 %v1096_v2  ;;  %vm1155_vm8 = vcmp.eq.f32.partialorder %v1096_v2, inf  ;;  %v1158_v21 = vand.u32 2147483648, %v1096_v2  ;;  %vm1157_vm9 = vcmp.eq.f32.partialorder %v1096_v2, 0.0 }
 0x1b8   : > { %v1088_v20 = vadd.f32 %v1080_v4, %v1072_v3  ;;  %v1040_v40 = vpop.trf.xlu0 }
 0x1b9   : > { %v1081_v6 = vmul.f32 %v1040_v40, %v1040_v40 }
 0x1ba   : > { %1528 = vrsqrt.f32 %v1088_v20  ;;  %vm1099_vm10 = vcmp.eq.f32.partialorder %v1088_v20, inf  ;;  %v1102_v31 = vand.u32 2147483648, %v1088_v20  ;;  %vm1101_vm11 = vcmp.eq.f32.partialorder %v1088_v20, 0.0 }
 0x1bb   : > { %v1089_v7 = vadd.f32 %v1081_v6, %v1073_v5 }
 0x1bc   : > { %v1041_v8 = vpop.trf.xlu0 }
 0x1bd   : > { %1530 = vrsqrt.f32 %v1089_v7  ;;  %v1082_v11 = vmul.f32 %v1041_v8, %v1041_v8  ;;  %vm1106_vm12 = vcmp.eq.f32.partialorder %v1089_v7, inf  ;;  %v1109_v24 = vand.u32 2147483648, %v1089_v7 }
 0x1be   : > { %vm1108_vm13 = vcmp.eq.f32.partialorder %v1089_v7, 0.0 }
 0x1bf   : > { %v1090_v12 = vadd.f32 %v1082_v11, %v1074_v9 }
 0x1c0   : > { %v1042_v15 = vpop.trf.xlu0 }
 0x1c1   : > { %v1527_v16 = vpop.eup %1526  ;;  %v1083_v17 = vmul.f32 %v1042_v15, %v1042_v15  ;;  %1532 = vrsqrt.f32 %v1090_v12  ;;  %vm1113_vm14 = vcmp.eq.f32.partialorder %v1090_v12, inf  ;;  %v1116_v27 = vand.u32 2147483648, %v1090_v12 }
 0x1c2   : > { %v1154_v62 = vmul.f32 %v1527_v16, %v1096_v2  ;;  %vm1115_vm15 = vcmp.eq.f32.partialorder %v1090_v12, 0.0 }
 0x1c3   : > { %v1091_v22 = vadd.f32 %v1083_v17, %v1075_v45 }
 0x1c4   : > { %v1529_v25 = vpop.eup %1528  ;;  %v1156_v26 = vsel %vm1155_vm8, %v1096_v2, %v1154_v62  ;;  %v1043_v1 = vpop.trf.xlu0 }
 0x1c5   : > { %v1098_v28 = vmul.f32 %v1529_v25, %v1088_v20  ;;  %v1159_v29 = vsel %vm1157_vm9, %v1158_v21, %v1156_v26  ;;  %1534 = vrsqrt.f32 %v1091_v22  ;;  %v1084_v18 = vmul.f32 %v1043_v1, %v1043_v1 }
 0x1c6   : > { %1168 = vst [vmem:[%s1831_s20 + $0x40] sm:$0x1] %v1159_v29  ;;  %vm1120_vm0 = vcmp.eq.f32.partialorder %v1091_v22, inf  ;;  %v1123_v10 = vand.u32 2147483648, %v1091_v22  ;;  %vm1122_vm1 = vcmp.eq.f32.partialorder %v1091_v22, 0.0 }
 0x1c7   : > { %v1531_v32 = vpop.eup %1530  ;;  %v1100_v33 = vsel %vm1099_vm10, %v1088_v20, %v1098_v28  ;;  %v1092_v35 = vadd.f32 %v1084_v18, %v1076_v30 }
 0x1c8   : > { %v1103_v34 = vsel %vm1101_vm11, %v1102_v31, %v1100_v33  ;;  %v1105_v23 = vmul.f32 %v1531_v32, %v1089_v7  ;;  %v1044_v36 = vpop.trf.xlu0 }
 0x1c9   : > { %1160 = vst [vmem:[%s1831_s20] sm:$0xff] %v1103_v34  ;;  %v1085_v37 = vmul.f32 %v1044_v36, %v1044_v36  ;;  %1536 = vrsqrt.f32 %v1092_v35  ;;  %vm1127_vm2 = vcmp.eq.f32.partialorder %v1092_v35, inf  ;;  %v1130_v61 = vand.u32 2147483648, %v1092_v35 }
 0x1ca   : > { %v1107_v38 = vsel %vm1106_vm12, %v1089_v7, %v1105_v23  ;;  %vm1129_vm3 = vcmp.eq.f32.partialorder %v1092_v35, 0.0 }
 0x1cb   : > { %v1110_v39 = vsel %vm1108_vm13, %v1109_v24, %v1107_v38  ;;  %v1093_v43 = vadd.f32 %v1085_v37, %v1077_v19  ;;  %v1533_v46 = vpop.eup %1532 }
 0x1cc   : > { %1161 = vst [vmem:[%s1831_s20 + $0x8] sm:$0xff] %v1110_v39  ;;  %v1045_v47 = vpop.trf.xlu0  ;;  %v1112_v48 = vmul.f32 %v1533_v46, %v1090_v12 }
 0x1cd   : > { %1538 = vrsqrt.f32 %v1093_v43  ;;  %v1086_v50 = vmul.f32 %v1045_v47, %v1045_v47  ;;  %vm1134_vm4 = vcmp.eq.f32.partialorder %v1093_v43, inf  ;;  %v1137_v2 = vand.u32 2147483648, %v1093_v43 }
 0x1ce   : > { %v1114_v44 = vsel %vm1113_vm14, %v1090_v12, %v1112_v48  ;;  %vm1136_vm5 = vcmp.eq.f32.partialorder %v1093_v43, 0.0 }
 0x1cf   : > { %v1535_v41 = vpop.eup %1534  ;;  %v1117_v42 = vsel %vm1115_vm15, %v1116_v27, %v1114_v44  ;;  %v1094_v52 = vadd.f32 %v1086_v50, %v1078_v49 }
 0x1d0   : > { %v1119_v51 = vmul.f32 %v1535_v41, %v1091_v22  ;;  %v1046_v54 = vpop.trf.xlu0  ;;  %1162 = vst [vmem:[%s1831_s20 + $0x10] sm:$0xff] %v1117_v42 }
 0x1d1   : > { %v1087_v53 = vmul.f32 %v1046_v54, %v1046_v54  ;;  %1540 = vrsqrt.f32 %v1094_v52  ;;  %vm1141_vm6 = vcmp.eq.f32.partialorder %v1094_v52, inf  ;;  %v1144_v5 = vand.u32 2147483648, %v1094_v52 }
 0x1d2   : > { %v1121_v56 = vsel %vm1120_vm0, %v1091_v22, %v1119_v51  ;;  %vm1143_vm7 = vcmp.eq.f32.partialorder %v1094_v52, 0.0 }
 0x1d3   : > { %v1124_v57 = vsel %vm1122_vm1, %v1123_v10, %v1121_v56  ;;  %v1095_v58 = vadd.f32 %v1087_v53, %v1079_v55  ;;  %v1537_v59 = vpop.eup %1536 }
 0x1d4   : > { %1163 = vst [vmem:[%s1831_s20 + $0x18] sm:$0xff] %v1124_v57  ;;  %v1126_v60 = vmul.f32 %v1537_v59, %v1092_v35 }
 0x1d5   : > { %1542 = vrsqrt.f32 %v1095_v58  ;;  %vm1148_vm8 = vcmp.eq.f32.partialorder %v1095_v58, inf  ;;  %v1151_v11 = vand.u32 2147483648, %v1095_v58  ;;  %vm1150_vm9 = vcmp.eq.f32.partialorder %v1095_v58, 0.0 }
 0x1d6   : > { %v1128_v14 = vsel %vm1127_vm2, %v1092_v35, %v1126_v60 }
 0x1d7   : > { %v1539_v13 = vpop.eup %1538  ;;  %v1131_v63 = vsel %vm1129_vm3, %v1130_v61, %v1128_v14 }
 0x1d8   : > { %v1133_v0 = vmul.f32 %v1539_v13, %v1093_v43  ;;  %1164 = vst [vmem:[%s1831_s20 + $0x20] sm:$0xff] %v1131_v63 }
 0x1da   : > { %v1135_v3 = vsel %vm1134_vm4, %v1093_v43, %v1133_v0 }
 0x1db   : > { %v1138_v4 = vsel %vm1136_vm5, %v1137_v2, %v1135_v3  ;;  %v1541_v20 = vpop.eup %1540 }
 0x1dc   : > { %1165 = vst [vmem:[%s1831_s20 + $0x28] sm:$0xff] %v1138_v4  ;;  %v1140_v40 = vmul.f32 %v1541_v20, %v1094_v52 }
 0x1de   : > { %v1142_v7 = vsel %vm1141_vm6, %v1094_v52, %v1140_v40 }
 0x1df   : > { %v1543_v6 = vpop.eup %1542  ;;  %v1145_v8 = vsel %vm1143_vm7, %v1144_v5, %v1142_v7 }
 0x1e0   : > { %v1147_v9 = vmul.f32 %v1543_v6, %v1095_v58  ;;  %1166 = vst [vmem:[%s1831_s20 + $0x30] sm:$0xff] %v1145_v8 }
 0x1e2   : > { %v1149_v12 = vsel %vm1148_vm8, %v1095_v58, %v1147_v9 }
 0x1e3   : > { %v1152_v15 = vsel %vm1150_vm9, %v1151_v11, %v1149_v12 }
 0x1e4   : > { %1167 = vst [vmem:[%s1831_s20 + $0x38] sm:$0xff] %v1152_v15 }
 0x1e5 PF: > { %s13_s14 = sadd.s32 1, %s1566_s14   ;;  %s1859_s12 = smov %s1562_s13 }
 0x1e6   : > { %p10_p5 = scmp.ge.s32.totalorder %s13_s14, 6   ;;  %s1860_s13 = smov %s1862_s15 }
 0x1e8   :  { %12 = sbr.rel (!%p10_p5) target bundleno = 2 (0x2), region = 65 }

</bundles_post_ra>
